<compile_context>
chip_gen: v6e
topology: v6e:2x2x1
jax: 0.10.0
libtpu: 0.0.40
codegen_flags: <defaults>
</compile_context>

<pallas_src>
import math
import functools

import jax
import jax.numpy as jnp
from jax.experimental import pallas as pl
from jax.experimental.pallas import tpu as pltpu


def positionalencoding1d(d_model, length):
    """JAX port of the torch helper: (length, d_model) sin/cos table."""
    if d_model % 2 != 0:
        raise ValueError(
            "Cannot use sin/cos positional encoding with odd dim (got dim={:d})".format(d_model)
        )
    position = jnp.arange(length, dtype=jnp.float32)[:, None]
    div_term = jnp.exp(
        jnp.arange(0, d_model, 2, dtype=jnp.float32) * -(math.log(10000.0) / d_model)
    )
    pe = jnp.zeros((length, d_model), jnp.float32)
    pe = pe.at[:, 0::2].set(jnp.sin(position * div_term))
    pe = pe.at[:, 1::2].set(jnp.cos(position * div_term))
    return pe


def _attention_kernel(x_ref, wstack_ref, qpe_ref, bv_ref, mask_ref, o_ref, *, d, bb):
    # x_ref    : (bb, D, N) f32       wstack_ref: (D+H, D) f32  = [W_v ; scale*qm@W_k]
    # qpe_ref  : (H, N) f32  (scale * qm @ (PE^T + b_k), fully folded K path)
    # bv_ref   : (D, 1) f32           mask_ref  : (H, D) f32 head-membership mask
    # o_ref    : (bb, 1, D) f32  (lane-dense rows)
    w = wstack_ref[...]            # (D+H, D)
    qpe = qpe_ref[...]             # (H, N)
    bv = bv_ref[...]               # (D, 1)
    mask_hd = mask_ref[...]        # (H, D)

    for bi in range(bb):           # static, unrolled (bb is small)
        x = x_ref[bi]                                                   # (D, N)
        # Single fused MXU matmul: rows :D -> v (pre-bias), rows D: -> dots (pre-qpe).
        vd = jnp.dot(w, x, preferred_element_type=jnp.float32)          # (D+H, N)
        v = vd[:d] + bv                                                  # (D, N)
        dots = vd[d:] + qpe                                              # (H, N)

        # softmax over the key axis (lanes); divide goes to the EUP slot.
        dots = dots - jnp.max(dots, axis=-1, keepdims=True)
        e = jnp.exp(dots)
        attn = e * pl.reciprocal(jnp.sum(e, axis=-1, keepdims=True), approx=True)

        # out_hd[h, c] = sum_p attn[h, p] * v[c, p]  (contract over lanes, MXU),
        # then extract the block-diagonal (head(c) == h) with a sublane reduce
        # to get a lane-dense (1, D) output row.
        out_hd = jax.lax.dot_general(
            attn, v, (((1,), (1,)), ((), ())),
            preferred_element_type=jnp.float32)                          # (H, D)
        o_ref[bi, :, :] = jnp.sum(out_hd * mask_hd, axis=0, keepdims=True)


def make_attention_constants(q_param, w_kv, b_kv, num_heads, n):
    """Build all kernel constants once (hoisted out of the per-call path)."""
    d2, d = w_kv.shape
    assert d2 == 2 * d and d % num_heads == 0
    dh = d // num_heads
    scale = dh ** (-0.5)

    w_kv = w_kv.astype(jnp.float32)
    b_kv = b_kv.astype(jnp.float32)
    b_k, b_v = b_kv[:d], b_kv[d:]

    head_of_col = jnp.arange(d) // dh
    mask_hd = (head_of_col[None, :] == jnp.arange(num_heads)[:, None]).astype(jnp.float32)  # (H, D)
    q_flat = q_param.reshape(d).astype(jnp.float32)        # flat idx = h*dh + j
    qm = mask_hd * q_flat[None, :]                          # (H, D) block-diagonal query

    # PE in transposed channel layout: pe_t[c, p] = pe[p, c % dh]
    pe_t = jnp.tile(positionalencoding1d(dh, n), (1, num_heads)).T       # (D, N)

    # Fold the whole K path: dots = qw @ x + qpe  (scale, PE, k-bias included).
    qw = scale * (qm @ w_kv[:d])                                          # (H, D)
    qpe = scale * (qm @ (pe_t + b_k[:, None]))                            # (H, N)

    # One stacked weight: rows :D -> v projection, rows D: -> dots projection.
    w_stacked = jnp.concatenate([w_kv[d:], qw], axis=0)                   # (D+H, D)
    bv_col = b_v.reshape(d, 1)                                            # (D, 1)
    return w_stacked, qpe, bv_col, mask_hd


def _default_batch_block(batch):
    # Single-TC chips (v5e/v6e): fold the whole batch into one grid step.
    # v7x has 2 TensorCores: keep >= 2 parallel grid steps so both TCs work.
    try:
        kind = jax.devices()[0].device_kind.lower()
    except Exception:
        kind = ""
    if "v7" in kind and batch >= 2 and batch % 2 == 0:
        return batch // 2
    return batch


def attention_forward(x_nchw, consts, num_heads, *, batch_block=None):
    """Pallas forward matching Attention.forward. x_nchw: (B, D, H, W) -> (B, D)."""
    w_stacked, qpe, bv_col, mask_hd = consts
    b, d, h, w = x_nchw.shape
    n = h * w
    dplus = w_stacked.shape[0]
    assert qpe.shape == (num_heads, n)

    bb = batch_block if batch_block is not None else _default_batch_block(b)
    if b % bb != 0:
        bb = 1
    grid = (b // bb,)

    # b d h w -> b d (h w): pure reshape, no transpose; N sits on the lane axis.
    x_dn = x_nchw.reshape(b, d, n).astype(jnp.float32)

    kernel = functools.partial(_attention_kernel, d=d, bb=bb)
    out = pl.pallas_call(
        kernel,
        out_shape=jax.ShapeDtypeStruct((b, 1, d), jnp.float32),
        grid=grid,
        in_specs=[
            pl.BlockSpec((bb, d, n), lambda i: (i, 0, 0)),          # x        (bb, D, N)
            pl.BlockSpec((dplus, d), lambda i: (0, 0)),             # [W_v;qw] (D+H, D)
            pl.BlockSpec((num_heads, n), lambda i: (0, 0)),         # qpe      (H, N)
            pl.BlockSpec((d, 1), lambda i: (0, 0)),                 # b_v      (D, 1)
            pl.BlockSpec((num_heads, d), lambda i: (0, 0)),         # mask     (H, D)
        ],
        out_specs=pl.BlockSpec((bb, 1, d), lambda i: (i, 0, 0)),    # out      (bb, 1, D)
        compiler_params=pltpu.CompilerParams(dimension_semantics=("parallel",)),
    )(x_dn, w_stacked, qpe, bv_col, mask_hd)
    return out.reshape(b, d)


def attention_ref(x_nchw, q_param, w_kv, b_kv, num_heads):
    """Plain-JAX f32 reference reproducing the PyTorch forward, for verification."""
    b, d, h, w = x_nchw.shape
    dh = d // num_heads
    n = h * w
    x = jnp.transpose(x_nchw, (0, 2, 3, 1)).reshape(b, n, d)
    kv = x @ w_kv.T + b_kv
    k, v = kv[..., :d], kv[..., d:]
    k = k.reshape(b, n, num_heads, dh).transpose(0, 2, 1, 3)
    v = v.reshape(b, n, num_heads, dh).transpose(0, 2, 1, 3)
    k = k + positionalencoding1d(dh, n)
    q = jnp.broadcast_to(q_param, (b, num_heads, 1, dh))
    dots = jnp.einsum('bhld,bhnd->bhln', q, k) * (dh ** -0.5)
    attn = jax.nn.softmax(dots, axis=-1)
    out = jnp.einsum('bhln,bhnd->bhld', attn, v)
    return out.transpose(0, 2, 1, 3).reshape(b, 1, d).squeeze(1)


if __name__ == "__main__":
    # small shapes consistent with the module: B=2, dim=32, heads=8, 16x16 spatial
    B, DIM, NUM_HEADS, H, W = 2, 32, 8, 16, 16
    DIM_HEAD = DIM // NUM_HEADS

    key = jax.random.PRNGKey(0)
    kq, kw, kb, kx = jax.random.split(key, 4)

    # deterministic synthetic parameters (shapes per Attention.__init__)
    q_param = jax.random.normal(kq, (1, NUM_HEADS, 1, DIM_HEAD), jnp.float32)
    bound = 1.0 / math.sqrt(DIM)
    w_kv = jax.random.uniform(kw, (2 * DIM, DIM), jnp.float32, -bound, bound)
    b_kv = jax.random.uniform(kb, (2 * DIM,), jnp.float32, -bound, bound)

    x = jax.random.normal(kx, (B, DIM, H, W), jnp.float32)

    # constants built once (hoisted out of the per-call path)
    consts = make_attention_constants(q_param, w_kv, b_kv, NUM_HEADS, H * W)

    out = attention_forward(x, consts, NUM_HEADS)
    out = jax.block_until_ready(out)

    ref = attention_ref(x, q_param, w_kv, b_kv, NUM_HEADS)
    assert out.shape == (B, DIM), out.shape
    # tolerance covers MXU default-precision matmuls + EUP approx reciprocal
    assert jnp.allclose(out, ref, rtol=2e-2, atol=2e-2), \
        float(jnp.max(jnp.abs(out - ref)))

    print("KERNEL_OK")
</pallas_src>

<mosaic_0001>
module attributes {stable_mosaic.version = 11 : i64} {
  func.func @_attention_kernel(%arg0: i32, %arg1: memref<2x32x256xf32, #tpu.memory_space<vmem>>, %arg2: memref<40x32xf32, #tpu.memory_space<vmem>>, %arg3: memref<8x256xf32, #tpu.memory_space<vmem>>, %arg4: memref<32x1xf32, #tpu.memory_space<vmem>>, %arg5: memref<8x32xf32, #tpu.memory_space<vmem>>, %arg6: memref<2x1x32xf32, #tpu.memory_space<vmem>>) attributes {dimension_semantics = [#tpu.dimension_semantics<parallel>], iteration_bounds = array<i64: 1>, scalar_prefetch = 0 : i64, scratch_operands = 0 : i64, tpu.core_type = #tpu.core_type<tc>, window_params = [{transform_indices = @transform_0, window_bounds = array<i64: 2, 32, 256>}, {pipeline_mode = #tpu.pipeline_mode<synchronous>, transform_indices = @transform_1, window_bounds = array<i64: 40, 32>}, {pipeline_mode = #tpu.pipeline_mode<synchronous>, transform_indices = @transform_2, window_bounds = array<i64: 8, 256>}, {pipeline_mode = #tpu.pipeline_mode<synchronous>, transform_indices = @transform_3, window_bounds = array<i64: 32, 1>}, {pipeline_mode = #tpu.pipeline_mode<synchronous>, transform_indices = @transform_4, window_bounds = array<i64: 8, 32>}, {transform_indices = @transform_5, window_bounds = array<i64: 2, 1, 32>}]} {
    %c0 = arith.constant 0 : index
    %c0_0 = arith.constant 0 : index
    %0 = vector.load %arg2[%c0, %c0_0] : memref<40x32xf32, #tpu.memory_space<vmem>>, vector<40x32xf32>
    %c0_1 = arith.constant 0 : index
    %c0_2 = arith.constant 0 : index
    %1 = vector.load %arg3[%c0_1, %c0_2] : memref<8x256xf32, #tpu.memory_space<vmem>>, vector<8x256xf32>
    %c0_3 = arith.constant 0 : index
    %c0_4 = arith.constant 0 : index
    %2 = vector.load %arg4[%c0_3, %c0_4] : memref<32x1xf32, #tpu.memory_space<vmem>>, vector<32x1xf32>
    %c0_5 = arith.constant 0 : index
    %c0_6 = arith.constant 0 : index
    %3 = vector.load %arg5[%c0_5, %c0_6] : memref<8x32xf32, #tpu.memory_space<vmem>>, vector<8x32xf32>
    %c0_7 = arith.constant 0 : index
    %c0_8 = arith.constant 0 : index
    %c0_9 = arith.constant 0 : index
    %4 = vector.load %arg1[%c0_7, %c0_8, %c0_9] : memref<2x32x256xf32, #tpu.memory_space<vmem>>, vector<1x32x256xf32>
    %5 = vector.shape_cast %4 : vector<1x32x256xf32> to vector<32x256xf32>
    %cst = arith.constant dense<0.000000e+00> : vector<40x256xf32>
    %6 = tpu.matmul %0, %5, %cst {dimension_numbers = #tpu.dot_dimension_numbers<[1], [0], [0], [1], [0, 0, 1, 1], [], []>} : vector<40x32xf32>, vector<32x256xf32>, vector<40x256xf32> -> vector<40x256xf32>
    %7 = vector.extract_strided_slice %6 {offsets = [0, 0], sizes = [32, 256], strides = [1, 1]} : vector<40x256xf32> to vector<32x256xf32>
    %8 = vector.broadcast %2 : vector<32x1xf32> to vector<32x256xf32>
    %9 = arith.addf %7, %8 : vector<32x256xf32>
    %10 = vector.extract_strided_slice %6 {offsets = [32, 0], sizes = [8, 256], strides = [1, 1]} : vector<40x256xf32> to vector<8x256xf32>
    %11 = arith.addf %10, %1 : vector<8x256xf32>
    %cst_10 = arith.constant dense<0xFF800000> : vector<8xf32>
    %12 = vector.multi_reduction <maximumf>, %11, %cst_10 [1] : vector<8x256xf32> to vector<8xf32>
    %13 = vector.shape_cast %12 : vector<8xf32> to vector<8x1xf32>
    %14 = vector.broadcast %13 : vector<8x1xf32> to vector<8x256xf32>
    %15 = arith.subf %11, %14 : vector<8x256xf32>
    %16 = math.exp %15 : vector<8x256xf32>
    %cst_11 = arith.constant dense<0.000000e+00> : vector<8xf32>
    %17 = vector.multi_reduction <add>, %16, %cst_11 [1] : vector<8x256xf32> to vector<8xf32>
    %18 = vector.shape_cast %17 : vector<8xf32> to vector<8x1xf32>
    %19 = tpu.reciprocal %18 {approx = true} : vector<8x1xf32> -> vector<8x1xf32>
    %20 = vector.broadcast %19 : vector<8x1xf32> to vector<8x256xf32>
    %21 = arith.mulf %16, %20 : vector<8x256xf32>
    %cst_12 = arith.constant dense<0.000000e+00> : vector<8x32xf32>
    %22 = tpu.matmul %21, %9, %cst_12 {dimension_numbers = #tpu.dot_dimension_numbers<[1], [1], [0], [0], [0, 0, 1, 0], [], []>} : vector<8x256xf32>, vector<32x256xf32>, vector<8x32xf32> -> vector<8x32xf32>
    %23 = arith.mulf %22, %3 : vector<8x32xf32>
    %cst_13 = arith.constant dense<0.000000e+00> : vector<32xf32>
    %24 = vector.multi_reduction <add>, %23, %cst_13 [0] : vector<8x32xf32> to vector<32xf32>
    %25 = vector.shape_cast %24 : vector<32xf32> to vector<1x32xf32>
    %c0_14 = arith.constant 0 : index
    %c0_15 = arith.constant 0 : index
    %c0_16 = arith.constant 0 : index
    %26 = vector.load %arg6[%c0_14, %c0_15, %c0_16] : memref<2x1x32xf32, #tpu.memory_space<vmem>>, vector<1x1x32xf32>
    %27 = vector.shape_cast %26 : vector<1x1x32xf32> to vector<1x32xf32>
    %28 = vector.shape_cast %25 : vector<1x32xf32> to vector<1x1x32xf32>
    tpu.vector_store %arg6[%c0_14, %c0_15, %c0_16], %28 {strides = array<i32>} : memref<2x1x32xf32, #tpu.memory_space<vmem>>, vector<1x1x32xf32>,
    %c1 = arith.constant 1 : index
    %c0_17 = arith.constant 0 : index
    %c0_18 = arith.constant 0 : index
    %29 = vector.load %arg1[%c1, %c0_17, %c0_18] : memref<2x32x256xf32, #tpu.memory_space<vmem>>, vector<1x32x256xf32>
    %30 = vector.shape_cast %29 : vector<1x32x256xf32> to vector<32x256xf32>
    %cst_19 = arith.constant dense<0.000000e+00> : vector<40x256xf32>
    %31 = tpu.matmul %0, %30, %cst_19 {dimension_numbers = #tpu.dot_dimension_numbers<[1], [0], [0], [1], [0, 0, 1, 1], [], []>} : vector<40x32xf32>, vector<32x256xf32>, vector<40x256xf32> -> vector<40x256xf32>
    %32 = vector.extract_strided_slice %31 {offsets = [0, 0], sizes = [32, 256], strides = [1, 1]} : vector<40x256xf32> to vector<32x256xf32>
    %33 = vector.broadcast %2 : vector<32x1xf32> to vector<32x256xf32>
    %34 = arith.addf %32, %33 : vector<32x256xf32>
    %35 = vector.extract_strided_slice %31 {offsets = [32, 0], sizes = [8, 256], strides = [1, 1]} : vector<40x256xf32> to vector<8x256xf32>
    %36 = arith.addf %35, %1 : vector<8x256xf32>
    %cst_20 = arith.constant dense<0xFF800000> : vector<8xf32>
    %37 = vector.multi_reduction <maximumf>, %36, %cst_20 [1] : vector<8x256xf32> to vector<8xf32>
    %38 = vector.shape_cast %37 : vector<8xf32> to vector<8x1xf32>
    %39 = vector.broadcast %38 : vector<8x1xf32> to vector<8x256xf32>
    %40 = arith.subf %36, %39 : vector<8x256xf32>
    %41 = math.exp %40 : vector<8x256xf32>
    %cst_21 = arith.constant dense<0.000000e+00> : vector<8xf32>
    %42 = vector.multi_reduction <add>, %41, %cst_21 [1] : vector<8x256xf32> to vector<8xf32>
    %43 = vector.shape_cast %42 : vector<8xf32> to vector<8x1xf32>
    %44 = tpu.reciprocal %43 {approx = true} : vector<8x1xf32> -> vector<8x1xf32>
    %45 = vector.broadcast %44 : vector<8x1xf32> to vector<8x256xf32>
    %46 = arith.mulf %41, %45 : vector<8x256xf32>
    %cst_22 = arith.constant dense<0.000000e+00> : vector<8x32xf32>
    %47 = tpu.matmul %46, %34, %cst_22 {dimension_numbers = #tpu.dot_dimension_numbers<[1], [1], [0], [0], [0, 0, 1, 0], [], []>} : vector<8x256xf32>, vector<32x256xf32>, vector<8x32xf32> -> vector<8x32xf32>
    %48 = arith.mulf %47, %3 : vector<8x32xf32>
    %cst_23 = arith.constant dense<0.000000e+00> : vector<32xf32>
    %49 = vector.multi_reduction <add>, %48, %cst_23 [0] : vector<8x32xf32> to vector<32xf32>
    %50 = vector.shape_cast %49 : vector<32xf32> to vector<1x32xf32>
    %c1_24 = arith.constant 1 : index
    %c0_25 = arith.constant 0 : index
    %c0_26 = arith.constant 0 : index
    %51 = vector.load %arg6[%c1_24, %c0_25, %c0_26] : memref<2x1x32xf32, #tpu.memory_space<vmem>>, vector<1x1x32xf32>
    %52 = vector.shape_cast %51 : vector<1x1x32xf32> to vector<1x32xf32>
    %53 = vector.shape_cast %50 : vector<1x32xf32> to vector<1x1x32xf32>
    tpu.vector_store %arg6[%c1_24, %c0_25, %c0_26], %53 {strides = array<i32>} : memref<2x1x32xf32, #tpu.memory_space<vmem>>, vector<1x1x32xf32>,
    return
  }
  func.func @transform_0(%arg0: i32) -> (i32, i32, i32) {
    %c0_i32 = arith.constant 0 : i32
    %c0_i32_0 = arith.constant 0 : i32
    %c0_i32_1 = arith.constant 0 : i32
    return %arg0, %c0_i32, %c0_i32_0 : i32, i32, i32
  }
  func.func @transform_1(%arg0: i32) -> (i32, i32) {
    %c0_i32 = arith.constant 0 : i32
    %c0_i32_0 = arith.constant 0 : i32
    %c0_i32_1 = arith.constant 0 : i32
    return %c0_i32, %c0_i32_0 : i32, i32
  }
  func.func @transform_2(%arg0: i32) -> (i32, i32) {
    %c0_i32 = arith.constant 0 : i32
    %c0_i32_0 = arith.constant 0 : i32
    %c0_i32_1 = arith.constant 0 : i32
    return %c0_i32, %c0_i32_0 : i32, i32
  }
  func.func @transform_3(%arg0: i32) -> (i32, i32) {
    %c0_i32 = arith.constant 0 : i32
    %c0_i32_0 = arith.constant 0 : i32
    %c0_i32_1 = arith.constant 0 : i32
    return %c0_i32, %c0_i32_0 : i32, i32
  }
  func.func @transform_4(%arg0: i32) -> (i32, i32) {
    %c0_i32 = arith.constant 0 : i32
    %c0_i32_0 = arith.constant 0 : i32
    %c0_i32_1 = arith.constant 0 : i32
    return %c0_i32, %c0_i32_0 : i32, i32
  }
  func.func @transform_5(%arg0: i32) -> (i32, i32, i32) {
    %c0_i32 = arith.constant 0 : i32
    %c0_i32_0 = arith.constant 0 : i32
    %c0_i32_1 = arith.constant 0 : i32
    return %arg0, %c0_i32, %c0_i32_0 : i32, i32, i32
  }
}

</mosaic_0001>

<bundles_post_ra>
// kernel: tpu_custom_call.1
= control target key start
LH: loop header
LB: loop body
LE: loop exit
PB: predicated region body
PF: predicated region fallthrough
CT: control target
= control target key end

     0   :  { %10 = vsyncpa [#allocation3], 0  ;;  %s750_s0 = inlined_call_operand.hbm [shape: f32[2,32,256], index: 0, kind: input, shape index: {}]   ;;  %s751_s1 = inlined_call_operand.vmem [shape: f32[40,32], index: 1, kind: input, shape index: {}]   ;;  %s752_s2 = inlined_call_operand.vmem [shape: f32[8,256], index: 2, kind: input, shape index: {}]   ;;  %s753_s3 = inlined_call_operand.vmem [shape: f32[32,1], index: 3, kind: input, shape index: {}]   ;;  %s754_s4 = inlined_call_operand.vmem [shape: f32[8,32], index: 4, kind: input, shape index: {}]   ;;  %s755_s5 = inlined_call_operand.hbm [shape: f32[2,1,32], index: 5, kind: output, shape index: {}]  }
   0x1   :  { %11 = vsyncpa [#allocation4], 0  ;;  %s592_s18 = smov [#allocation2]  }
   0x2   :  { %s17_s19 = sshll.u32 %s592_s18, 4  ;;  %s18_s19 = int_to_ptr.vmem [resolvable:$true] %s17_s19 }
   0x3   :  { %s556_s20 = scalar_lea.vmem %s18_s19, 2048  ;;  %p561_p1 = scmp.lt.s32.totalorder %s18_s19, %s18_s19 }
   0x4   :  { %p557_p0 = scmp.ne.s32.totalorder %s18_s19, %s556_s20  ;;  %p562_p2 = scmp.lt.s32.totalorder %s556_s20, %s556_s20 }
   0x6   :  { %p563_p3 = por %p562_p2, %p561_p1 }
   0x8   :  { %p564_p4 = pnand %p563_p3, %p557_p0 }
   0xa   :  { %567 = shalt.err (!%p564_p4)
}
   0xb   :  { %s593_s21 = smov 256   ;;  %s594_s22 = smov 16  }
   0xc   :  { %23 = dma.hbm_to_vmem [thread:$0]  %s750_s0, 2048, %s18_s19, [#allocation3], %s593_s21, %s593_s21, %s594_s22  }
   0xd   :  { %588 = dma.done.wait [#allocation3], 2048  }
   0xe   :  { %589 = vsyncadd [#allocation3], 4294965248  ;;  %v595_v0 = vmov 0.0   ;;  %v596_v1 = vmov 0   ;;  %v54_v2 = vld [vmem:[#allocation2 + $0x38] sm:$0xff]  ;;  %v53_v3 = vld [vmem:[#allocation2 + $0x30] sm:$0xff] }
   0xf   :  { %135 = vmatprep.mubr.f32.mxu0 %v595_v0  ;;  %534 = vset.pattern.permute.xlu1 %v596_v1  ;;  %v52_v4 = vld [vmem:[#allocation2 + $0x28] sm:$0xff]  ;;  %v51_v5 = vld [vmem:[#allocation2 + $0x20] sm:$0xff]  ;;  %v50_v6 = vld [vmem:[#allocation2 + $0x18] sm:$0xff]  ;;  %vm55_vm0 = vcmask 261120   ;;  %vm289_vm1 = vcmask 253952  }
  0x10   :  { %535 = vset.pattern.permute.xlu0 %v596_v1  ;;  %95 = vmatprep.subr.mxu0 %v54_v2  ;;  %v49_v7 = vld [vmem:[#allocation2 + $0x10] sm:$0xff]  ;;  %v48_v8 = vld [vmem:[#allocation2 + $0x8] sm:$0xff]  ;;  %v45_v9 = vld [vmem:[%s753_s3 + $0x18] sm:$0xff] }
  0x11   :  { %96 = vmatpush1.msra.mxu0 %v53_v3  ;;  %v47_v10 = vld [vmem:[#allocation2] sm:$0xff]  ;;  %183 = vperm.xlu1 %534, %v45_v9   ;;  %v44_v12 = vld [vmem:[%s753_s3 + $0x10] sm:$0xff]  ;;  %v651_v13 = vld [vmem:[%s751_s1 + $0x8] sm:$0xff] }
  0x12   :  { %97 = vmatprep.subr.mxu0 %v52_v4  ;;  %v640_v11 = vld [vmem:[%s751_s1] sm:$0xff]  ;;  %v662_v15 = vld [vmem:[%s751_s1 + $0x10] sm:$0xff]  ;;  %v670_v16 = vld [vmem:[%s751_s1 + $0x18] sm:$0xff] }
  0x13   :  { %98 = vmatpush1.msra.mxu0 %v51_v5  ;;  %v42_v14 = vld [vmem:[%s753_s3] sm:$0xff]  ;;  %v696_v32 = vld [vmem:[%s752_s2 + $0x8] sm:$0xff]  ;;  %v299_v56 = vld [vmem:[#allocation2 + $0x78] sm:$0xff] }
  0x14   :  { %99 = vmatprep.subr.mxu0 %v50_v6  ;;  %v678_v17 = vld [vmem:[%s751_s1 + $0x20] sm:$0xff]  ;;  %v43_v47 = vld [vmem:[%s753_s3 + $0x8] sm:$0xff]  ;;  %v298_v59 = vld [vmem:[#allocation2 + $0x70] sm:$0xff] }
  0x15   :  { %100 = vmatpush1.msra.mxu0 %v49_v7  ;;  %178 = vperm.xlu1 %534, %v44_v12   ;;  %v691_v30 = vld [vmem:[%s752_s2] sm:$0xff]  ;;  %v297_v60 = vld [vmem:[#allocation2 + $0x68] sm:$0xff]  ;;  %v295_v62 = vld [vmem:[#allocation2 + $0x58] sm:$0xff] }
  0x16   :  { %101 = vmatprep.subr.mxu0 %v48_v8  ;;  %v296_v61 = vld [vmem:[#allocation2 + $0x60] sm:$0xff]  ;;  %v294_v63 = vld [vmem:[#allocation2 + $0x50] sm:$0xff]  ;;  %v293_v1 = vld [vmem:[#allocation2 + $0x48] sm:$0xff] }
  0x17   :  { %102 = vmatpush1.msra.mxu0 %v47_v10  ;;  %v292_v2 = vld [vmem:[#allocation2 + $0x40] sm:$0xff] }
  0x18   :  { %517 = vmatmul.mubr.msk.f32.vlgmr.msra.gmra.mxu0 %vm55_vm0, %v640_v11  ;;  %v46_v3 = vld [vmem:[%s754_s4] sm:$0xff]  ;;  %s597_s4 = smov [#allocation5]  }
  0x19   :  { %141 = vmatprep.mubr.f32.mxu0 %v595_v0  ;;  %168 = vperm.xlu1 %534, %v42_v14   ;;  %s505_s20 = sshll.u32 %s597_s4, 4  ;;  %s506_s20 = int_to_ptr.vmem [resolvable:$true] %s505_s20 }
  0x1a   :  { %s568_s21 = scalar_lea.vmem %s506_s20, 32  ;;  %p573_p6 = scmp.lt.s32.totalorder %s506_s20, %s506_s20 }
  0x1b   :  { %p569_p5 = scmp.ne.s32.totalorder %s506_s20, %s568_s21  ;;  %p574_p7 = scmp.lt.s32.totalorder %s568_s21, %s568_s21 }
  0x1c   :  { %518 = vmatmul.mubr.msk.f32.gmra.mxu0 %vm55_vm0, %v651_v13 }
  0x1d   :  { %147 = vmatprep.mubr.f32.mxu0 %v595_v0  ;;  %p575_p8 = por %p574_p7, %p573_p6 }
  0x1f   :  { %p576_p9 = pnand %p575_p8, %p569_p5 }
  0x20   :  { %519 = vmatmul.mubr.msk.f32.gmra.mxu0 %vm55_vm0, %v662_v15 }
  0x21   :  { %153 = vmatprep.mubr.f32.mxu0 %v595_v0 }
  0x24   :  { %520 = vmatmul.mubr.msk.f32.gmra.mxu0 %vm55_vm0, %v670_v16 }
  0x25   :  { %159 = vmatprep.mubr.f32.mxu0 %v595_v0 }
  0x28   :  { %521 = vmatmul.mubr.msk.f32.gmra.mxu0 %vm55_vm0, %v678_v17 }
  0x8c   :  { %v682_v23 = vpop.permute.xlu1 %183 }
  0x90   :  { %v685_v28 = vpop.permute.xlu1 %178 }
  0x94   :  { %v709_v52 = vpop.permute.xlu1 %168 }
  0xd8   :  { %v137_v18 = vpop.f32.mrf.mxu0 }
  0xd9   :  { %v186_v55 = vadd.f32 %v709_v52, %v137_v18 }
  0xda   :  { %v139_v19 = vpop.f32.mrf.mxu0 }
  0xdb   :  { %v187_v53 = vadd.f32 %v709_v52, %v139_v19 }
  0xdc   :  { %v143_v20 = vpop.f32.mrf.mxu0 }
  0xde   :  { %v145_v21 = vpop.f32.mrf.mxu0 }
  0xe0   :  { %v149_v22 = vpop.f32.mrf.mxu0 }
  0xe1   :  { %v190_v37 = vadd.f32 %v685_v28, %v149_v22 }
  0xe2   :  { %v151_v24 = vpop.f32.mrf.mxu0 }
  0xe3   :  { %v191_v33 = vadd.f32 %v685_v28, %v151_v24 }
  0xe4   :  { %v155_v25 = vpop.f32.mrf.mxu0 }
  0xe5   :  { %v192_v29 = vadd.f32 %v682_v23, %v155_v25 }
  0xe6   :  { %v157_v26 = vpop.f32.mrf.mxu0 }
  0xe7   :  { %v193_v27 = vadd.f32 %v682_v23, %v157_v26 }
  0xe8   :  { %v161_v31 = vpop.f32.mrf.mxu0 }
  0xe9   :  { %235 = vmatprep.subr.mxu1 %v193_v27  ;;  %v194_v35 = vadd.f32 %v161_v31, %v691_v30 }
  0xea   :  { %v163_v34 = vpop.f32.mrf.mxu0  ;;  %236 = vmatpush1.xpose.msra.mxu1 %v192_v29 }
  0xeb   :  { %v195_v36 = vadd.f32 %v163_v34, %v696_v32  ;;  %237 = vmatprep.subr.mxu1 %v191_v33 }
  0xed   :  { %v196_v38 = vmax.f32 %v194_v35, %v195_v36 }
  0xee   :  { %238 = vmatpush1.xpose.msra.mxu1 %v190_v37 }
  0xef   :  { %197 = vmax.xlane.f32.xlu0 %v196_v38 }
 0x178   :  { %v198_v39 = vpop.xlane.xlu0 %197 }
 0x179   :  { %v199_v40 = vsub.f32 %v194_v35, %v198_v39  ;;  %v200_v41 = vsub.f32 %v195_v36, %v198_v39 }
 0x17b   :  { %v201_v42 = vmul.f32 1.442695, %v199_v40  ;;  %v203_v43 = vmul.f32 1.442695, %v200_v41 }
 0x17d   :  { %536 = vpow2.f32 %v201_v42 }
 0x17e   :  { %538 = vpow2.f32 %v203_v43 }
 0x18a   :  { %v537_v44 = vpop.eup %536 }
 0x18b   :  { %v539_v45 = vpop.eup %538 }
 0x18c   :  { %v205_v46 = vadd.f32 %v539_v45, %v537_v44 }
 0x18e   :  { %206 = vadd.xlane.f32.xlu0 %v205_v46 }
 0x1a4   :  { %173 = vperm.xlu0 %535, %v43_v47  }
 0x217   :  { %v207_v48 = vpop.xlane.xlu0 %206 }
 0x218   :  { %540 = vrcp.f32 %v207_v48 }
 0x21f   :  { %v705_v49 = vpop.permute.xlu0 %173 }
 0x220   :  { %v188_v50 = vadd.f32 %v705_v49, %v143_v20  ;;  %v189_v51 = vadd.f32 %v705_v49, %v145_v21 }
 0x222   :  { %239 = vmatprep.subr.mxu1 %v189_v51 }
 0x223   :  { %240 = vmatpush1.xpose.msra.mxu1 %v188_v50 }
 0x224   :  { %241 = vmatprep.subr.mxu1 %v187_v53 }
 0x225   :  { %v541_v54 = vpop.eup %540 }
 0x226   :  { %v210_v57 = vmul.f32 %v541_v54, %v539_v45  ;;  %v209_v58 = vmul.f32 %v541_v54, %v537_v44 }
 0x227   :  { %242 = vmatpush1.xpose.msra.mxu1 %v186_v55 }
 0x228   :  { %275 = vmatprep.mubr.f32.mxu1 %v210_v57  ;;  %324 = vmatprep.subr.mxu1 %v299_v56 }
 0x22a   :  { %276 = vmatmul.mubr.f32.vlgmr.msra.gmra.mxu1 %v209_v58 }
 0x22b   :  { %325 = vmatpush1.msra.mxu1 %v298_v59  ;;  %364 = vmatprep.mubr.f32.mxu1 %v595_v0 }
 0x22c   :  { %326 = vmatprep.subr.mxu1 %v297_v60 }
 0x22d   :  { %327 = vmatpush1.msra.mxu1 %v296_v61 }
 0x22e   :  { %328 = vmatprep.subr.mxu1 %v295_v62 }
 0x22f   :  { %329 = vmatpush1.msra.mxu1 %v294_v63 }
 0x230   :  { %330 = vmatprep.subr.mxu1 %v293_v1 }
 0x231   :  { %331 = vmatpush1.msra.mxu1 %v292_v2 }
 0x232   :  { %522 = vmatmul.mubr.msk.f32.vlgmr.msra.gmra.mxu1 %vm55_vm0, %v640_v11 }
 0x233   :  { %370 = vmatprep.mubr.f32.mxu1 %v595_v0 }
 0x236   :  { %523 = vmatmul.mubr.msk.f32.gmra.mxu1 %vm55_vm0, %v651_v13 }
 0x237   :  { %376 = vmatprep.mubr.f32.mxu1 %v595_v0 }
 0x23a   :  { %524 = vmatmul.mubr.msk.f32.gmra.mxu1 %vm55_vm0, %v662_v15 }
 0x23b   :  { %382 = vmatprep.mubr.f32.mxu1 %v595_v0 }
 0x23e   :  { %525 = vmatmul.mubr.msk.f32.gmra.mxu1 %vm55_vm0, %v670_v16 }
 0x23f   :  { %388 = vmatprep.mubr.f32.mxu1 %v595_v0 }
 0x242   :  { %526 = vmatmul.mubr.msk.f32.gmra.mxu1 %vm55_vm0, %v678_v17 }
 0x2ea   :  { %v277_v4 = vpop.f32.mrf.mxu1 }
 0x2eb   :  { %v281_v5 = vmul.f32 %v277_v4, %v46_v3 }
 0x2ec   :  { %v279_v6 = vpop.f32.mrf.mxu1 }
 0x2ed   :  { %v282_v7 = vsel %vm55_vm0, %v281_v5, 0.0 }
 0x2ee   :  { %v283_v8 = vrot.slane %v282_v7, 4 }
 0x2f0   :  { %v284_v9 = vadd.f32 %v283_v8, %v282_v7 }
 0x2f2   :  { %v285_v10 = vrot.slane %v284_v9, 2  ;;  %v366_v11 = vpop.f32.mrf.mxu1 }
 0x2f3   :  { %v395_v36 = vadd.f32 %v366_v11, %v709_v52 }
 0x2f4   :  { %v286_v12 = vadd.f32 %v285_v10, %v284_v9  ;;  %v368_v13 = vpop.f32.mrf.mxu1 }
 0x2f5   :  { %v396_v35 = vadd.f32 %v368_v13, %v709_v52 }
 0x2f6   :  { %v287_v14 = vrot.slane %v286_v12, 1  ;;  %v372_v0 = vpop.f32.mrf.mxu1 }
 0x2f8   :  { %v288_v15 = vadd.f32 %v287_v14, %v286_v12  ;;  %v374_v16 = vpop.f32.mrf.mxu1 }
 0x2f9   :  { %v398_v33 = vadd.f32 %v374_v16, %v705_v49 }
 0x2fa   :  { %v378_v17 = vpop.f32.mrf.mxu1  ;;  %290 = vst.msk [vmem:[#allocation5] sm:$0x1] %vm289_vm1, %v288_v15 }
 0x2fb   :  { %v399_v31 = vadd.f32 %v378_v17, %v685_v28 }
 0x2fc   :  { %v380_v18 = vpop.f32.mrf.mxu1 }
 0x2fd   :  { %v400_v25 = vadd.f32 %v380_v18, %v685_v28 }
 0x2fe   :  { %v384_v19 = vpop.f32.mrf.mxu1 }
 0x2ff   :  { %v401_v22 = vadd.f32 %v384_v19, %v682_v23 }
 0x300   :  { %v386_v20 = vpop.f32.mrf.mxu1 }
 0x301   :  { %v402_v21 = vadd.f32 %v386_v20, %v682_v23  ;;  %v397_v23 = vadd.f32 %v372_v0, %v705_v49 }
 0x302   :  { %v390_v24 = vpop.f32.mrf.mxu1 }
 0x303   :  { %444 = vmatprep.subr.mxu0 %v402_v21  ;;  %v403_v27 = vadd.f32 %v390_v24, %v691_v30 }
 0x304   :  { %v392_v26 = vpop.f32.mrf.mxu1  ;;  %445 = vmatpush1.xpose.msra.mxu0 %v401_v22 }
 0x305   :  { %v404_v29 = vadd.f32 %v392_v26, %v696_v32  ;;  %446 = vmatprep.subr.mxu0 %v400_v25 }
 0x307   :  { %v405_v34 = vmax.f32 %v403_v27, %v404_v29 }
 0x308   :  { %447 = vmatpush1.xpose.msra.mxu0 %v399_v31 }
 0x309   :  { %448 = vmatprep.subr.mxu0 %v398_v33  ;;  %406 = vmax.xlane.f32.xlu1 %v405_v34 }
 0x30c   :  { %449 = vmatpush1.xpose.msra.mxu0 %v397_v23 }
 0x30d   :  { %450 = vmatprep.subr.mxu0 %v396_v35 }
 0x310   :  { %451 = vmatpush1.xpose.msra.mxu0 %v395_v36 }
 0x392   :  { %v407_v30 = vpop.xlane.xlu1 %406 }
 0x393   :  { %v408_v32 = vsub.f32 %v403_v27, %v407_v30  ;;  %v409_v37 = vsub.f32 %v404_v29, %v407_v30 }
 0x395   :  { %v410_v38 = vmul.f32 1.442695, %v408_v32  ;;  %v412_v28 = vmul.f32 1.442695, %v409_v37 }
 0x397   :  { %542 = vpow2.f32 %v410_v38 }
 0x398   :  { %544 = vpow2.f32 %v412_v28 }
 0x3a4   :  { %v543_v39 = vpop.eup %542 }
 0x3a5   :  { %v545_v40 = vpop.eup %544 }
 0x3a6   :  { %v414_v41 = vadd.f32 %v545_v40, %v543_v39 }
 0x3a8   :  { %415 = vadd.xlane.f32.xlu1 %v414_v41 }
 0x431   :  { %v416_v42 = vpop.xlane.xlu1 %415 }
 0x432   :  { %546 = vrcp.f32 %v416_v42 }
 0x43f   :  { %v547_v43 = vpop.eup %546 }
 0x440   :  { %v419_v44 = vmul.f32 %v547_v43, %v545_v40  ;;  %v418_v45 = vmul.f32 %v547_v43, %v543_v39 }
 0x442   :  { %484 = vmatprep.mubr.f32.mxu0 %v419_v44 }
 0x443   :  { %485 = vmatmul.mubr.f32.vlgmr.msra.gmra.mxu0 %v418_v45 }
 0x503   :  { %v486_v46 = vpop.f32.mrf.mxu0 }
 0x504   :  { %v490_v47 = vmul.f32 %v486_v46, %v46_v3 }
 0x505   :  { %v488_v48 = vpop.f32.mrf.mxu0 }
 0x506   :  { %v491_v49 = vsel %vm55_vm0, %v490_v47, 0.0 }
 0x507   :  { %v492_v50 = vrot.slane %v491_v49, 4 }
 0x509   :  { %v493_v51 = vadd.f32 %v492_v50, %v491_v49 }
 0x50b   :  { %v494_v52 = vrot.slane %v493_v51, 2 }
 0x50d   :  { %v495_v53 = vadd.f32 %v494_v52, %v493_v51 }
 0x50f   :  { %v496_v54 = vrot.slane %v495_v53, 1 }
 0x511   :  { %v497_v55 = vadd.f32 %v496_v54, %v495_v53 }
 0x513   :  { %499 = vst.msk [vmem:[#allocation5 + $0x1] sm:$0x1] %vm289_vm1, %v497_v55 }
 0x514   :  { %579 = shalt.err (!%p576_p9)
}
 0x515   :  { %s598_s23 = smov 1  }
 0x516   :  { %511 = dma.vmem_to_hbm [thread:$0]  %s506_s20, 32, %s755_s5, [#allocation4], %s594_s22, %s594_s22, %s598_s23  }
 0x517   :  { %590 = dma.done.wait [#allocation4], 32  }
 0x518   :  { %591 = vsyncadd [#allocation4], 4294967264 }
 0x519   :  { %515 = vsyncpa [#allocation3], 1 }
 0x51a   :  { %516 = vsyncpa [#allocation4], 1 }

</bundles_post_ra>
